<compile_context>
chip_gen: v6e
topology: v6e:2x2x1
jax: 0.10.0
libtpu: 0.0.40
codegen_flags: <defaults>
</compile_context>

<pallas_src>
import math

import jax
import jax.numpy as jnp
from jax.experimental import pallas as pl
from jax.experimental.pallas import tpu as pltpu


def _make_selfatt_kernel(n_out: int, mm_dtype, approx_recip: bool):
    inv_sqrt_d = 1.0 / math.sqrt(n_out)

    def kernel(x_ref, w_ref, b_ref, o_ref):
        bt, s, n_in = x_ref.shape

        # Flatten the batch tile into the MXU M-dim: (bt*S, n_in).
        x2d = x_ref[...].reshape(bt * s, n_in)

        # Fused Q/K/V projection: one matmul, one bias add, one tanh (EUP).
        qkv = jnp.dot(
            x2d.astype(mm_dtype),
            w_ref[...].astype(mm_dtype),
            preferred_element_type=jnp.float32,
        ) + b_ref[...]
        qkv = jnp.tanh(qkv)                                     # f32, (bt*S, 3*n_out)

        q = qkv[:, 0 * n_out:1 * n_out].reshape(bt, s, n_out)
        k = qkv[:, 1 * n_out:2 * n_out].reshape(bt, s, n_out)
        v = qkv[:, 2 * n_out:3 * n_out].reshape(bt, s, n_out)

        # alpha = q @ k^T / sqrt(d): contract the last dim directly (no explicit transpose).
        logits = jnp.einsum(
            "bqd,bkd->bqk",
            q.astype(mm_dtype), k.astype(mm_dtype),
            preferred_element_type=jnp.float32,
        ) * inv_sqrt_d                                          # (bt, S, S) f32

        # Numerically-stable softmax along the key axis (max/sum on XLU, exp on EUP).
        logits = logits - jnp.max(logits, axis=-1, keepdims=True)
        p = jnp.exp(logits)
        denom = jnp.sum(p, axis=-1, keepdims=True)
        att = p * pl.reciprocal(denom, approx=approx_recip)

        out = jnp.einsum(
            "bqk,bkd->bqd",
            att.astype(mm_dtype), v.astype(mm_dtype),
            preferred_element_type=jnp.float32,
        )
        o_ref[...] = out.astype(o_ref.dtype)

    return kernel


def _vmem_estimate_bytes(bt: int, s: int, n_in: int, n_out: int) -> int:
    rows = bt * s
    io = 2 * 4 * (rows * n_in + rows * n_out)                      # double-buffered x / out tiles
    w = 2 * 4 * (n_in * 3 * n_out + 3 * n_out)                     # fused weights + bias
    tmp = 4 * (rows * 3 * n_out + bt * s * s + 3 * rows * n_out)   # qkv, logits, q/k/v temporaries
    return io + w + tmp


def _choose_block_b(B: int, s: int, n_in: int, n_out: int,
                    min_rows: int = 256, max_rows: int = 1024,
                    vmem_budget: int = 12 * 1024 * 1024) -> int:
    """Largest divisor of B whose tile fits the VMEM budget / row target.

    Once a step already carries >= min_rows of MXU work, keep >= 2 grid steps so both
    v7x TensorCores (megacore) get a share of the batch.
    """
    best = 1
    for d in range(1, B + 1):
        if B % d:
            continue
        if d * s > max_rows or _vmem_estimate_bytes(d, s, n_in, n_out) > vmem_budget:
            break
        if B // d == 1 and B > 1 and best * s >= min_rows:
            continue
        best = d
    return best


def self_att(x, wq, bq, wk, bk, wv, bv, *, block_b=None, precision="fast"):
    """x: (..., S, n_in) f32; w*: (n_in, n_out); b*: (n_out,). Returns (..., S, n_out).

    precision: "fast" (bf16 MXU operands, f32 accumulation, EUP approx reciprocal)
               or "highest" (f32 operands, exact reciprocal).
    """
    *lead, S, n_in = x.shape
    n_out = wq.shape[1]
    B = 1
    for d in lead:
        B *= d
    x3d = x.reshape(B, S, n_in)

    if precision == "fast":
        mm_dtype, approx_recip = jnp.bfloat16, True
    else:
        mm_dtype, approx_recip = jnp.float32, False

    # Fuse the three projections wrapper-side: one weight DMA, one matmul per step.
    w = jnp.concatenate([wq, wk, wv], axis=1)                             # (n_in, 3*n_out)
    b = jnp.concatenate(
        [jnp.reshape(bq, (1, -1)), jnp.reshape(bk, (1, -1)), jnp.reshape(bv, (1, -1))],
        axis=1,
    )                                                                     # (1, 3*n_out)

    if block_b is None:
        block_b = _choose_block_b(B, S, n_in, n_out)
    assert B % block_b == 0, "block_b must divide the (flattened) batch"
    grid = (B // block_b,)

    kernel = _make_selfatt_kernel(n_out, mm_dtype, approx_recip)

    out = pl.pallas_call(
        kernel,
        out_shape=jax.ShapeDtypeStruct((B, S, n_out), x.dtype),
        grid_spec=pltpu.PrefetchScalarGridSpec(
            num_scalar_prefetch=0,
            grid=grid,
            in_specs=[
                pl.BlockSpec((block_b, S, n_in), lambda i: (i, 0, 0)),
                pl.BlockSpec((n_in, 3 * n_out), lambda i: (0, 0)),
                pl.BlockSpec((1, 3 * n_out), lambda i: (0, 0)),
            ],
            out_specs=pl.BlockSpec((block_b, S, n_out), lambda i: (i, 0, 0)),
        ),
        compiler_params=pltpu.CompilerParams(
            dimension_semantics=("parallel",),
            vmem_limit_bytes=32 * 1024 * 1024,
        ),
    )(x3d, w, b)

    return out.reshape(*lead, S, n_out)


def _reference(x, wq, bq, wk, bk, wv, bv):
    q = jnp.tanh(x @ wq + bq)
    k = jnp.tanh(x @ wk + bk)
    v = jnp.tanh(x @ wv + bv)
    alpha = jnp.einsum("...qd,...kd->...qk", q, k) / math.sqrt(q.shape[-1])
    att = jax.nn.softmax(alpha, axis=-1)
    return jnp.einsum("...qk,...kd->...qd", att, v)


if __name__ == "__main__":
    # Small shapes consistent with the module's forward: x [..., size, dim]
    B, S, n_in, n_out = 4, 8, 32, 32

    key = jax.random.PRNGKey(0)
    kx, kq, kbq, kk, kbk, kv, kbv = jax.random.split(key, 7)

    x = jax.random.normal(kx, (B, S, n_in), dtype=jnp.float32)

    # Deterministic parameter init (mirrors nn.Linear's uniform(-1/sqrt(n_in), 1/sqrt(n_in)))
    bound = 1.0 / math.sqrt(n_in)
    wq = jax.random.uniform(kq, (n_in, n_out), jnp.float32, -bound, bound)
    bq = jax.random.uniform(kbq, (n_out,), jnp.float32, -bound, bound)
    wk = jax.random.uniform(kk, (n_in, n_out), jnp.float32, -bound, bound)
    bk = jax.random.uniform(kbk, (n_out,), jnp.float32, -bound, bound)
    wv = jax.random.uniform(kv, (n_in, n_out), jnp.float32, -bound, bound)
    bv = jax.random.uniform(kbv, (n_out,), jnp.float32, -bound, bound)

    ref = _reference(x, wq, bq, wk, bk, wv, bv)

    # Exact path (f32 MXU operands, exact reciprocal): matches the PyTorch semantics tightly.
    out_exact = jax.block_until_ready(self_att(x, wq, bq, wk, bk, wv, bv, precision="highest"))
    assert out_exact.shape == (B, S, n_out)
    assert jnp.allclose(out_exact, ref, atol=1e-5, rtol=1e-5), "mismatch (highest precision path)"

    # Fast path (default): bf16 MXU operands + f32 accumulation + EUP approx reciprocal.
    out_fast = jax.block_until_ready(self_att(x, wq, bq, wk, bk, wv, bv))
    assert out_fast.shape == (B, S, n_out)
    assert jnp.allclose(out_fast, ref, atol=5e-2, rtol=5e-2), "mismatch (fast precision path)"

    print("KERNEL_OK")
</pallas_src>

<mosaic_0001>
module attributes {stable_mosaic.version = 11 : i64} {
  func.func @kernel(%arg0: i32, %arg1: memref<4x8x32xf32, #tpu.memory_space<vmem>>, %arg2: memref<32x96xf32, #tpu.memory_space<vmem>>, %arg3: memref<1x96xf32, #tpu.memory_space<vmem>>, %arg4: memref<4x8x32xf32, #tpu.memory_space<vmem>>) attributes {dimension_semantics = [#tpu.dimension_semantics<parallel>], iteration_bounds = array<i64: 1>, scalar_prefetch = 0 : i64, scratch_operands = 0 : i64, tpu.core_type = #tpu.core_type<tc>, window_params = [{transform_indices = @transform_0, window_bounds = array<i64: 4, 8, 32>}, {pipeline_mode = #tpu.pipeline_mode<synchronous>, transform_indices = @transform_1, window_bounds = array<i64: 32, 96>}, {pipeline_mode = #tpu.pipeline_mode<synchronous>, transform_indices = @transform_2, window_bounds = array<i64: 1, 96>}, {transform_indices = @transform_3, window_bounds = array<i64: 4, 8, 32>}]} {
    %c0 = arith.constant 0 : index
    %c0_0 = arith.constant 0 : index
    %c0_1 = arith.constant 0 : index
    %0 = vector.load %arg1[%c0, %c0_0, %c0_1] : memref<4x8x32xf32, #tpu.memory_space<vmem>>, vector<4x8x32xf32>
    %1 = vector.shape_cast %0 : vector<4x8x32xf32> to vector<32x32xf32>
    %c0_2 = arith.constant 0 : index
    %c0_3 = arith.constant 0 : index
    %2 = vector.load %arg2[%c0_2, %c0_3] : memref<32x96xf32, #tpu.memory_space<vmem>>, vector<32x96xf32>
    %cst = arith.constant dense<0.000000e+00> : vector<32x96xf32>
    %3 = tpu.matmul %1, %2, %cst {dimension_numbers = #tpu.dot_dimension_numbers<[1], [0], [0], [1], [0, 0, 1, 1], [], []>} : vector<32x32xf32>, vector<32x96xf32>, vector<32x96xf32> -> vector<32x96xf32>
    %c0_4 = arith.constant 0 : index
    %c0_5 = arith.constant 0 : index
    %4 = vector.load %arg3[%c0_4, %c0_5] : memref<1x96xf32, #tpu.memory_space<vmem>>, vector<1x96xf32>
    %5 = vector.broadcast %4 : vector<1x96xf32> to vector<32x96xf32>
    %6 = arith.addf %3, %5 : vector<32x96xf32>
    %7 = math.tanh %6 : vector<32x96xf32>
    %8 = vector.extract_strided_slice %7 {offsets = [0, 0], sizes = [32, 32], strides = [1, 1]} : vector<32x96xf32> to vector<32x32xf32>
    %9 = vector.shape_cast %8 : vector<32x32xf32> to vector<4x8x32xf32>
    %10 = vector.extract_strided_slice %7 {offsets = [0, 32], sizes = [32, 32], strides = [1, 1]} : vector<32x96xf32> to vector<32x32xf32>
    %11 = vector.shape_cast %10 : vector<32x32xf32> to vector<4x8x32xf32>
    %12 = vector.extract_strided_slice %7 {offsets = [0, 64], sizes = [32, 32], strides = [1, 1]} : vector<32x96xf32> to vector<32x32xf32>
    %13 = vector.shape_cast %12 : vector<32x32xf32> to vector<4x8x32xf32>
    "tpu.trace_start"() <{level = 10 : i32, message = "bqd,bkd->bqk"}> : () -> ()
    %cst_6 = arith.constant dense<0.000000e+00> : vector<4x8x8xf32>
    %14 = tpu.matmul %9, %11, %cst_6 {dimension_numbers = #tpu.dot_dimension_numbers<[2], [2], [1], [1], [0, 0, 0, 1, 1, 1], [0], [0]>} : vector<4x8x32xf32>, vector<4x8x32xf32>, vector<4x8x8xf32> -> vector<4x8x8xf32>
    "tpu.trace_stop"() : () -> ()
    %cst_7 = arith.constant 0.176776692 : f32
    %15 = vector.broadcast %cst_7 : f32 to vector<4x8x8xf32>
    %16 = arith.mulf %14, %15 : vector<4x8x8xf32>
    %cst_8 = arith.constant dense<0xFF800000> : vector<4x8xf32>
    %17 = vector.multi_reduction <maximumf>, %16, %cst_8 [2] : vector<4x8x8xf32> to vector<4x8xf32>
    %18 = vector.shape_cast %17 : vector<4x8xf32> to vector<4x8x1xf32>
    %19 = vector.broadcast %18 : vector<4x8x1xf32> to vector<4x8x8xf32>
    %20 = arith.subf %16, %19 : vector<4x8x8xf32>
    %21 = math.exp %20 : vector<4x8x8xf32>
    %cst_9 = arith.constant dense<0.000000e+00> : vector<4x8xf32>
    %22 = vector.multi_reduction <add>, %21, %cst_9 [2] : vector<4x8x8xf32> to vector<4x8xf32>
    %23 = vector.shape_cast %22 : vector<4x8xf32> to vector<4x8x1xf32>
    %24 = tpu.reciprocal %23 : vector<4x8x1xf32> -> vector<4x8x1xf32>
    %25 = vector.broadcast %24 : vector<4x8x1xf32> to vector<4x8x8xf32>
    %26 = arith.mulf %21, %25 : vector<4x8x8xf32>
    "tpu.trace_start"() <{level = 10 : i32, message = "bqk,bkd->bqd"}> : () -> ()
    %cst_10 = arith.constant dense<0.000000e+00> : vector<4x8x32xf32>
    %27 = tpu.matmul %26, %13, %cst_10 {dimension_numbers = #tpu.dot_dimension_numbers<[2], [1], [1], [2], [0, 0, 0, 1, 1, 2], [0], [0]>} : vector<4x8x8xf32>, vector<4x8x32xf32>, vector<4x8x32xf32> -> vector<4x8x32xf32>
    "tpu.trace_stop"() : () -> ()
    %c0_11 = arith.constant 0 : index
    %c0_12 = arith.constant 0 : index
    %c0_13 = arith.constant 0 : index
    %28 = vector.load %arg4[%c0_11, %c0_12, %c0_13] : memref<4x8x32xf32, #tpu.memory_space<vmem>>, vector<4x8x32xf32>
    tpu.vector_store %arg4[%c0_11, %c0_12, %c0_13], %27 {strides = array<i32>} : memref<4x8x32xf32, #tpu.memory_space<vmem>>, vector<4x8x32xf32>,
    return
  }
  func.func @transform_0(%arg0: i32) -> (i32, i32, i32) {
    %c0_i32 = arith.constant 0 : i32
    %c0_i32_0 = arith.constant 0 : i32
    %c0_i32_1 = arith.constant 0 : i32
    return %arg0, %c0_i32, %c0_i32_0 : i32, i32, i32
  }
  func.func @transform_1(%arg0: i32) -> (i32, i32) {
    %c0_i32 = arith.constant 0 : i32
    %c0_i32_0 = arith.constant 0 : i32
    %c0_i32_1 = arith.constant 0 : i32
    return %c0_i32, %c0_i32_0 : i32, i32
  }
  func.func @transform_2(%arg0: i32) -> (i32, i32) {
    %c0_i32 = arith.constant 0 : i32
    %c0_i32_0 = arith.constant 0 : i32
    %c0_i32_1 = arith.constant 0 : i32
    return %c0_i32, %c0_i32_0 : i32, i32
  }
  func.func @transform_3(%arg0: i32) -> (i32, i32, i32) {
    %c0_i32 = arith.constant 0 : i32
    %c0_i32_0 = arith.constant 0 : i32
    %c0_i32_1 = arith.constant 0 : i32
    return %arg0, %c0_i32, %c0_i32_0 : i32, i32, i32
  }
}

</mosaic_0001>

<bundles_post_ra>
// kernel: tpu_custom_call.1
= control target key start
LH: loop header
LB: loop body
LE: loop exit
PB: predicated region body
PF: predicated region fallthrough
CT: control target
= control target key end

     0   :  { %8 = vsyncpa [#allocation3], 0  ;;  %s1158_s0 = inlined_call_operand.hbm [shape: f32[4,8,32], index: 0, kind: input, shape index: {}]   ;;  %s1159_s1 = inlined_call_operand.hbm [shape: f32[32,96], index: 1, kind: input, shape index: {}]   ;;  %s1160_s2 = inlined_call_operand.vmem [shape: f32[1,96], index: 2, kind: input, shape index: {}]   ;;  %s1161_s3 = inlined_call_operand.hbm [shape: f32[4,8,32], index: 3, kind: output, shape index: {}]  }
   0x1   :  { %9 = vsyncpa [#allocation6], 0 }
   0x2   :  { %10 = vsyncpa [#allocation4], 0  ;;  %s1037_s12 = smov [#allocation2]  }
   0x3   :  { %s16_s13 = sshll.u32 %s1037_s12, 4  ;;  %s17_s13 = int_to_ptr.vmem [resolvable:$true] %s16_s13 }
   0x4   :  { %s979_s14 = scalar_lea.vmem %s17_s13, 512  ;;  %p984_p1 = scmp.lt.s32.totalorder %s17_s13, %s17_s13 }
   0x5   :  { %p980_p0 = scmp.ne.s32.totalorder %s17_s13, %s979_s14  ;;  %p985_p2 = scmp.lt.s32.totalorder %s979_s14, %s979_s14 }
   0x7   :  { %p986_p3 = por %p985_p2, %p984_p1 }
   0x9   :  { %p987_p4 = pnand %p986_p3, %p980_p0 }
   0xb   :  { %990 = shalt.err (!%p987_p4)
}
   0xc   :  { %s1038_s15 = smov 128   ;;  %s1039_s16 = smov 8  }
   0xd   :  { %22 = dma.hbm_to_vmem [thread:$0]  %s1158_s0, 512, %s17_s13, [#allocation3], %s1038_s15, %s1038_s15, %s1039_s16  }
   0xe   :  { %s1040_s19 = smov [#allocation5]  }
   0xf   :  { %s28_s20 = sshll.u32 %s1040_s19, 4  ;;  %s29_s20 = int_to_ptr.vmem [resolvable:$true] %s28_s20 }
  0x10   :  { %s999_s21 = scalar_lea.vmem %s29_s20, 512  ;;  %p1004_p6 = scmp.lt.s32.totalorder %s29_s20, %s29_s20 }
  0x11   :  { %p1000_p5 = scmp.ne.s32.totalorder %s29_s20, %s999_s21  ;;  %p1005_p7 = scmp.lt.s32.totalorder %s999_s21, %s999_s21 }
  0x13   :  { %p1006_p8 = por %p1005_p7, %p1004_p6 }
  0x15   :  { %p1007_p9 = pnand %p1006_p8, %p1000_p5 }
  0x17   :  { %1010 = shalt.err (!%p1007_p9)
}
  0x18   :  { %34 = dma.hbm_to_vmem [thread:$0]  %s1159_s1, 512, %s29_s20, [#allocation6], %s1038_s15, %s1038_s15, %s1039_s16  }
  0x19   :  { %1031 = dma.done.wait [#allocation3], 512  }
  0x1a   :  { %1032 = vsyncadd [#allocation3], 4294966784 }
  0x1b   :  { %1033 = dma.done.wait [#allocation6], 512  }
  0x1c   :  { %1034 = vsyncadd [#allocation6], 4294966784  ;;  %vm58_vm0 = vcmask 261120   ;;  %v50_v0 = vld [vmem:[#allocation5 + $0x18] sm:$0xff]  ;;  %v49_v1 = vld [vmem:[#allocation5 + $0x10] sm:$0xff]  ;;  %v1041_v8 = vmov 0.0  }
  0x1d   :  { %884 = vmatprep.subr.mxu0 %v50_v0  ;;  %v43_v2 = vld [vmem:[#allocation2] sm:$0xff]  ;;  %v48_v3 = vld [vmem:[#allocation5 + $0x8] sm:$0xff]  ;;  %v45_v6 = vld [vmem:[#allocation2 + $0x10] sm:$0xff]  ;;  %898 = vmatprep.subr.mxu1 %v1041_v8  ;;  %vm1042_vm1 = vmmov 0   ;;  %vm472_vm2 = vcmask 64512   ;;  %s1044_s24 = smov 64  }
  0x1e   :  { %885 = vmatpush3.msra.mxu0 %v50_v0  ;;  %892 = vmatprep.mubr.msk.f32.mxu0 %vm58_vm0, %v43_v2  ;;  %v47_v4 = vld [vmem:[#allocation5] sm:$0xff]  ;;  %v44_v5 = vld [vmem:[#allocation2 + $0x8] sm:$0xff]  ;;  %v46_v7 = vld [vmem:[#allocation2 + $0x18] sm:$0xff]  ;;  %s1045_s25 = smov [#allocation7]  }
  0x1f   :  { %886 = vmatprep.subr.mxu0 %v49_v1  ;;  %v843_v10 = vld [vmem:[%s1160_s2] ss:$0 sm:$0xff]  ;;  %900 = vmatprep.mubr.msk.f32.mxu1 %vm1042_vm1, %v1041_v8  ;;  %s1043_s2 = smov 96   ;;  %s830_s26 = sshll.u32 %s1045_s25, 4  ;;  %s831_s26 = int_to_ptr.vmem [resolvable:$true] %s830_s26 }
  0x20   :  { %887 = vmatpush3.msra.mxu0 %v49_v1  ;;  %s1011_s27 = scalar_lea.vmem %s831_s26, 512  ;;  %p1016_p11 = scmp.lt.s32.totalorder %s831_s26, %s831_s26 }
  0x21   :  { %888 = vmatprep.subr.mxu0 %v48_v3  ;;  %p1012_p10 = scmp.ne.s32.totalorder %s831_s26, %s1011_s27  ;;  %p1017_p12 = scmp.lt.s32.totalorder %s1011_s27, %s1011_s27 }
  0x22   :  { %889 = vmatpush3.msra.mxu0 %v48_v3 }
  0x23   :  { %890 = vmatprep.subr.mxu0 %v47_v4  ;;  %p1018_p13 = por %p1017_p12, %p1016_p11 }
  0x24   :  { %891 = vmatpush3.msra.mxu0 %v47_v4 }
  0x25   :  { %893 = vmatmul.mubr.msk.f32.vlgmr.msra.gmra.mxu0 %vm58_vm0, %v44_v5  ;;  %913 = vmatprep.subr.mxu0 %v1041_v8  ;;  %p1019_p0 = pnand %p1018_p13, %p1012_p10 }
  0x26   :  { %895 = vmatprep.mubr.msk.f32.mxu0 %vm58_vm0, %v45_v6 }
  0x29   :  { %896 = vmatmul.mubr.msk.f32.gmra.mxu0 %vm58_vm0, %v46_v7 }
  0x2a   :  { %915 = vmatprep.mubr.msk.f32.mxu0 %vm1042_vm1, %v1041_v8 }
  0xe5   :  { %v894_v9 = vpop.f32.mrf.mxu0 }
  0xe6   :  { %v143_v13 = vadd.f32 %v894_v9, %v843_v10 }
  0xe7   :  { %v137_v11 = vpop.f32.mrf.mxu0 }
  0xe8   :  { %v138_v12 = vadd.f32 %v843_v10, %v137_v11 }
  0xe9   :  { %v897_v14 = vpop.f32.mrf.mxu0 }
  0xea   :  { %947 = vtanh.f32 %v138_v12  ;;  %v153_v16 = vadd.f32 %v897_v14, %v843_v10 }
  0xeb   :  { %v147_v15 = vpop.f32.mrf.mxu0  ;;  %949 = vtanh.f32 %v143_v13 }
  0xec   :  { %v148_v17 = vadd.f32 %v843_v10, %v147_v15 }
  0xee   :  { %951 = vtanh.f32 %v148_v17 }
  0xef   :  { %953 = vtanh.f32 %v153_v16 }
  0xf7   :  { %v948_v18 = vpop.eup %947 }
  0xf8   :  { %161 = vrot.lane.b32.xlu0 %v948_v18, %s1043_s2  ;;  %v1091_v19 = vpop.eup %949 }
  0xfb   :  { %v1093_v20 = vpop.eup %951 }
  0xfc   :  { %315 = vrot.lane.b32.xlu1 %v1093_v20, %s1043_s2  ;;  %238 = vrot.lane.b32.xlu0 %v1091_v19, %s1043_s2  ;;  %v1097_v21 = vpop.eup %953 }
 0x100   :  { %392 = vrot.lane.b32.xlu1 %v1097_v21, %s1043_s2 }
 0x16a   :  { %v162_v22 = vpop.permute.xlu0 %161 }
 0x16b   :  { %899 = vmatpush3.xpose.msk.msra.mxu1 %vm58_vm0, %v162_v22 }
 0x16c   :  { %903 = vmatprep.subr.mxu1 %v1041_v8 }
 0x16e   :  { %v316_v23 = vpop.permute.xlu1 %315  ;;  %901 = vmatmul.mubr.msk.f32.vlgmr.msra.gmra.mxu1 %vm58_vm0, %v948_v18  ;;  %v239_v24 = vpop.permute.xlu0 %238 }
 0x16f   :  { %904 = vmatpush3.xpose.msk.msra.mxu1 %vm58_vm0, %v239_v24  ;;  %905 = vmatprep.mubr.msk.f32.mxu1 %vm1042_vm1, %v1041_v8 }
 0x170   :  { %908 = vmatprep.subr.mxu1 %v1041_v8 }
 0x172   :  { %v393_v25 = vpop.permute.xlu1 %392  ;;  %906 = vmatmul.mubr.msk.f32.vlgmr.msra.gmra.mxu1 %vm58_vm0, %v1091_v19 }
 0x173   :  { %909 = vmatpush3.xpose.msk.msra.mxu1 %vm58_vm0, %v316_v23  ;;  %914 = vmatpush3.xpose.msk.msra.mxu0 %vm58_vm0, %v393_v25 }
 0x174   :  { %910 = vmatprep.mubr.msk.f32.mxu1 %vm1042_vm1, %v1041_v8  ;;  %918 = vmatprep.subr.mxu1 %v1041_v8 }
 0x175   :  { %923 = vmatprep.subr.mxu0 %v1041_v8 }
 0x176   :  { %911 = vmatmul.mubr.msk.f32.vlgmr.msra.gmra.mxu1 %vm58_vm0, %v1093_v20  ;;  %916 = vmatmul.mubr.msk.f32.vlgmr.msra.gmra.mxu0 %vm58_vm0, %v1097_v21 }
 0x177   :  { %920 = vmatprep.mubr.msk.f32.mxu1 %vm1042_vm1, %v1041_v8  ;;  %925 = vmatprep.mubr.msk.f32.mxu0 %vm1042_vm1, %v1041_v8 }
 0x22e   :  { %v233_v26 = vpop.f32.mrf.mxu1 }
 0x22f   :  { %v468_v27 = vmul.f32 0.17677669, %v233_v26 }
 0x230   :  { %v902_v28 = vpop.f32.mrf.mxu1 }
 0x231   :  { %v473_v29 = vsel %vm472_vm2, %v468_v27, -inf }
 0x232   :  { %474 = vmax.xlane.f32.xlu0 %v473_v29  ;;  %v310_v30 = vpop.f32.mrf.mxu1 }
 0x233   :  { %v469_v31 = vmul.f32 0.17677669, %v310_v30 }
 0x234   :  { %v907_v32 = vpop.f32.mrf.mxu1 }
 0x235   :  { %v476_v33 = vsel %vm472_vm2, %v469_v31, -inf }
 0x236   :  { %v464_v34 = vpop.f32.mrf.mxu0  ;;  %477 = vmax.xlane.f32.xlu1 %v476_v33  ;;  %v387_v35 = vpop.f32.mrf.mxu1 }
 0x237   :  { %v470_v36 = vmul.f32 0.17677669, %v387_v35  ;;  %v471_v39 = vmul.f32 0.17677669, %v464_v34 }
 0x238   :  { %v912_v37 = vpop.f32.mrf.mxu1  ;;  %v917_v38 = vpop.f32.mrf.mxu0 }
 0x239   :  { %v479_v40 = vsel %vm472_vm2, %v470_v36, -inf  ;;  %v482_v41 = vsel %vm472_vm2, %v471_v39, -inf }
 0x23a   :  { %480 = vmax.xlane.f32.xlu0 %v479_v40 }
 0x23e   :  { %483 = vmax.xlane.f32.xlu0 %v482_v41 }
 0x247   :  { %517 = vrot.lane.b32.xlu1 %v948_v18, %s1044_s24 }
 0x2bb   :  { %v475_v42 = vpop.xlane.xlu0 %474 }
 0x2bc   :  { %v485_v43 = vsub.f32 %v468_v27, %v475_v42 }
 0x2be   :  { %v489_v44 = vmul.f32 1.442695, %v485_v43 }
 0x2bf   :  { %v478_v45 = vpop.xlane.xlu1 %477 }
 0x2c0   :  { %955 = vpow2.f32 %v489_v44  ;;  %v486_v48 = vsub.f32 %v469_v31, %v478_v45 }
 0x2c2   :  { %v491_v51 = vmul.f32 1.442695, %v486_v48 }
 0x2c3   :  { %v518_v46 = vpop.permute.xlu1 %517  ;;  %v481_v47 = vpop.xlane.xlu0 %480 }
 0x2c4   :  { %919 = vmatpush3.msra.mxu1 %v518_v46  ;;  %v487_v59 = vsub.f32 %v470_v36, %v481_v47 }
 0x2c5   :  { %928 = vmatprep.subr.mxu1 %v1041_v8 }
 0x2c6   :  { %v493_v60 = vmul.f32 1.442695, %v487_v59 }
 0x2c7   :  { %v484_v49 = vpop.xlane.xlu0 %483 }
 0x2c8   :  { %v488_v50 = vsub.f32 %v471_v39, %v484_v49 }
 0x2ca   :  { %v495_v52 = vmul.f32 1.442695, %v488_v50 }
 0x2cc   :  { %957 = vpow2.f32 %v495_v52 }
 0x2cd   :  { %v956_v53 = vpop.eup %955  ;;  %959 = vpow2.f32 %v491_v51 }
 0x2ce   :  { %v497_v54 = vsel %vm472_vm2, %v956_v53, 0.0  ;;  %961 = vpow2.f32 %v493_v60 }
 0x2cf   :  { %498 = vadd.xlane.f32.xlu1 %v497_v54 }
 0x2d9   :  { %v958_v55 = vpop.eup %957 }
 0x2da   :  { %v506_v56 = vsel %vm472_vm2, %v958_v55, 0.0  ;;  %v960_v57 = vpop.eup %959 }
 0x2db   :  { %507 = vadd.xlane.f32.xlu0 %v506_v56  ;;  %v500_v58 = vsel %vm472_vm2, %v960_v57, 0.0  ;;  %v962_v61 = vpop.eup %961 }
 0x2dc   :  { %v503_v62 = vsel %vm472_vm2, %v962_v61, 0.0 }
 0x2df   :  { %501 = vadd.xlane.f32.xlu0 %v500_v58 }
 0x2e0   :  { %669 = vrot.lane.b32.xlu1 %v1093_v20, %s1044_s24 }
 0x2f5   :  { %593 = vrot.lane.b32.xlu0 %v1091_v19, %s1044_s24 }
 0x304   :  { %504 = vadd.xlane.f32.xlu1 %v503_v62 }
 0x315   :  { %745 = vrot.lane.b32.xlu1 %v1097_v21, %s1044_s24 }
 0x358   :  { %v499_v63 = vpop.xlane.xlu1 %498 }
 0x359   :  { %963 = vrcp.f32 %v499_v63 }
 0x35c   :  { %v670_v4 = vpop.permute.xlu1 %669 }
 0x364   :  { %v508_v0 = vpop.xlane.xlu0 %507 }
 0x366   :  { %v964_v1 = vpop.eup %963 }
 0x367   :  { %v513_v2 = vmul.f32 %v964_v1, %v956_v53 }
 0x368   :  { %v502_v3 = vpop.xlane.xlu0 %501 }
 0x369   :  { %965 = vrcp.f32 %v502_v3  ;;  %921 = vmatmul.mubr.msk.f32.vlgmr.msra.gmra.mxu1 %vm472_vm2, %v513_v2 }
 0x36a   :  { %929 = vmatpush3.msra.mxu1 %v670_v4  ;;  %930 = vmatprep.mubr.msk.f32.mxu1 %vm1042_vm1, %v1041_v8  ;;  %967 = vrcp.f32 %v508_v0 }
 0x36c   :  { %v594_v5 = vpop.permute.xlu0 %593 }
 0x36d   :  { %924 = vmatpush3.msra.mxu0 %v594_v5 }
 0x36e   :  { %933 = vmatprep.subr.mxu0 %v1041_v8 }
 0x376   :  { %v966_v6 = vpop.eup %965 }
 0x377   :  { %v514_v7 = vmul.f32 %v966_v6, %v960_v57  ;;  %v968_v10 = vpop.eup %967 }
 0x378   :  { %v516_v12 = vmul.f32 %v968_v10, %v958_v55 }
 0x379   :  { %926 = vmatmul.mubr.msk.f32.vlgmr.msra.gmra.mxu0 %vm472_vm2, %v514_v7 }
 0x37a   :  { %935 = vmatprep.mubr.msk.f32.mxu0 %vm1042_vm1, %v1041_v8 }
 0x38d   :  { %v505_v9 = vpop.xlane.xlu1 %504 }
 0x38e   :  { %969 = vrcp.f32 %v505_v9 }
 0x391   :  { %v746_v11 = vpop.permute.xlu1 %745 }
 0x392   :  { %934 = vmatpush3.msra.mxu0 %v746_v11 }
 0x393   :  { %936 = vmatmul.mubr.msk.f32.vlgmr.msra.gmra.mxu0 %vm472_vm2, %v516_v12 }
 0x39b   :  { %v970_v13 = vpop.eup %969 }
 0x39c   :  { %v515_v14 = vmul.f32 %v970_v13, %v962_v61 }
 0x39e   :  { %931 = vmatmul.mubr.msk.f32.vlgmr.msra.gmra.mxu1 %vm472_vm2, %v515_v14 }
 0x429   :  { %v589_v15 = vpop.f32.mrf.mxu1 }
 0x42a   :  { %821 = vst.msk [vmem:[#allocation7] sm:$0xff] %vm58_vm0, %v589_v15 }
 0x42b   :  { %v922_v16 = vpop.f32.mrf.mxu1 }
 0x439   :  { %v665_v17 = vpop.f32.mrf.mxu0 }
 0x43a   :  { %822 = vst.msk [vmem:[#allocation7 + $0x8] sm:$0xff] %vm58_vm0, %v665_v17 }
 0x43b   :  { %v927_v8 = vpop.f32.mrf.mxu0 }
 0x453   :  { %v817_v18 = vpop.f32.mrf.mxu0 }
 0x454   :  { %824 = vst.msk [vmem:[#allocation7 + $0x18] sm:$0xff] %vm58_vm0, %v817_v18 }
 0x455   :  { %v937_v19 = vpop.f32.mrf.mxu0 }
 0x45e   :  { %v741_v20 = vpop.f32.mrf.mxu1 }
 0x45f   :  { %823 = vst.msk [vmem:[#allocation7 + $0x10] sm:$0xff] %vm58_vm0, %v741_v20 }
 0x460   :  { %v932_v21 = vpop.f32.mrf.mxu1 }
 0x461   :  { %1022 = shalt.err (!%p1019_p0)
}
 0x462   :  { %836 = dma.vmem_to_hbm [thread:$0]  %s831_s26, 512, %s1161_s3, [#allocation4], %s1038_s15, %s1038_s15, %s1039_s16  }
 0x463   :  { %1035 = dma.done.wait [#allocation4], 512  }
 0x464   :  { %1036 = vsyncadd [#allocation4], 4294966784 }
 0x465   :  { %840 = vsyncpa [#allocation3], 1 }
 0x466   :  { %841 = vsyncpa [#allocation6], 1 }
 0x467   :  { %842 = vsyncpa [#allocation4], 1 }

</bundles_post_ra>
